<compile_context>
chip_gen: v5e
topology: v5e:2x2
jax: 0.10.0
libtpu: 0.0.40
codegen_flags: <defaults>
</compile_context>

<pallas_src>
import functools

import jax
import jax.numpy as jnp
from jax.experimental import pallas as pl
from jax.experimental.pallas import tpu as pltpu


# ----------------------------------------------------------------------------
# Helpers
# ----------------------------------------------------------------------------
def _round_up(x: int, m: int) -> int:
    return ((x + m - 1) // m) * m


# ----------------------------------------------------------------------------
# Fused Pallas kernel (entire MLP in one body)
# ----------------------------------------------------------------------------
def _make_fused_mlp_kernel(n_hidden: int):
    """Kernel body: refs = (x, w1, b1, ..., wH, bH, w_last, out).

    Weights are bf16 (fast MXU path), biases f32; matmuls accumulate in f32
    and bias-add/ReLU run in f32 (v5e's VPU has no bf16).  The activation is
    re-cast to bf16 only for the next matmul.
    """

    def kernel(*refs):
        x_ref = refs[0]
        o_ref = refs[-1]
        h = x_ref[...].astype(jnp.bfloat16)
        idx = 1
        for _ in range(n_hidden):
            w = refs[idx][...]              # bf16 (K, N_pad)
            b = refs[idx + 1][...]          # f32  (1, N_pad): sublane-broadcast add
            idx += 2
            a = jnp.dot(h, w, preferred_element_type=jnp.float32) + b
            h = jnp.maximum(a, 0.0).astype(jnp.bfloat16)
        w_last = refs[idx][...]             # bf16 (K_pad, d_out)
        o_ref[...] = jnp.dot(
            h, w_last, preferred_element_type=jnp.float32
        ).astype(o_ref.dtype)

    return kernel


# ----------------------------------------------------------------------------
# Parameter init (PyTorch nn.Linear-style) + hidden-dim padding / bf16 cast
# ----------------------------------------------------------------------------
def init_dnn_params(key, layers_size):
    """U(-1/sqrt(fan_in), 1/sqrt(fan_in)); final layer has bias=False."""
    params = []
    n_hidden = len(layers_size) - 2
    for i in range(n_hidden):
        fan_in, fan_out = layers_size[i], layers_size[i + 1]
        key, kw, kb = jax.random.split(key, 3)
        bound = 1.0 / jnp.sqrt(fan_in)
        w = jax.random.uniform(kw, (fan_in, fan_out), jnp.float32, -bound, bound)
        b = jax.random.uniform(kb, (1, fan_out), jnp.float32, -bound, bound)
        params.append((w, b))
    fan_in, fan_out = layers_size[-2], layers_size[-1]
    key, kw = jax.random.split(key)
    bound = 1.0 / jnp.sqrt(fan_in)
    w_last = jax.random.uniform(kw, (fan_in, fan_out), jnp.float32, -bound, bound)
    params.append((w_last, None))
    return params


def pad_params_for_kernel(params, layers_size):
    """Zero-pad only the HIDDEN feature dims up to multiples of 128 (lane
    width); the input and output feature dims keep their natural sizes so the
    kernel's HBM reads/writes of x / out are not inflated.  Weights are cast
    to bfloat16 (zero pads are exact in bf16); biases stay f32."""
    dims = list(layers_size)
    for i in range(1, len(layers_size) - 1):
        dims[i] = _round_up(layers_size[i], 128)

    padded = []
    for i, (w, b) in enumerate(params):
        k, n = w.shape
        k_pad, n_pad = dims[i], dims[i + 1]
        w_p = jnp.zeros((k_pad, n_pad), jnp.float32).at[:k, :n].set(w)
        w_p = w_p.astype(jnp.bfloat16)
        if b is not None:
            b_p = jnp.zeros((1, n_pad), jnp.float32).at[:, :n].set(b)
        else:
            b_p = None
        padded.append((w_p, b_p))
    return padded


# ----------------------------------------------------------------------------
# Forward pass: one fused pallas_call
# ----------------------------------------------------------------------------
@functools.partial(jax.jit, static_argnames=("layers_size",))
def dnn_forward(padded_params, x, layers_size):
    """x: (B, layers_size[0]) f32  ->  (B, layers_size[-1]) f32."""
    layers_size = tuple(layers_size)
    n_hidden = len(layers_size) - 2
    d_in = layers_size[0]
    d_out = layers_size[-1]

    B = x.shape[0]
    if B <= 128:
        # Tiny batch: single block (sublane-padded); launch-latency bound anyway.
        TB = _round_up(B, 8)
    else:
        # Large batch: big tiles amortize the ~0.35us per-grid-step overhead,
        # but keep >= 2 blocks so both TensorCores are used on v7x.
        TB = 512
        while TB > 128 and (B + TB - 1) // TB < 2:
            TB //= 2
    B_pad = _round_up(B, TB)
    grid = (B_pad // TB,)

    # Pad only the batch dim (if needed); feature dims stay natural.
    if B_pad != B:
        x = jnp.pad(x, ((0, B_pad - B), (0, 0)))

    # Assemble kernel operands: x, (w, b) per hidden layer, final w.
    # Weights/biases have constant index_maps -> VMEM-resident, single-buffered.
    operands = [x]
    in_specs = [pl.BlockSpec((TB, d_in), lambda i: (i, 0))]
    for li in range(n_hidden):
        w_p, b_p = padded_params[li]
        operands += [w_p, b_p]
        in_specs += [
            pl.BlockSpec(w_p.shape, lambda i: (0, 0),
                         pipeline_mode=pl.Buffered(1)),
            pl.BlockSpec(b_p.shape, lambda i: (0, 0),
                         pipeline_mode=pl.Buffered(1)),
        ]
    w_last_p, _ = padded_params[-1]
    operands.append(w_last_p)
    in_specs.append(pl.BlockSpec(w_last_p.shape, lambda i: (0, 0),
                                 pipeline_mode=pl.Buffered(1)))

    out = pl.pallas_call(
        _make_fused_mlp_kernel(n_hidden),
        out_shape=jax.ShapeDtypeStruct((B_pad, d_out), jnp.float32),
        grid=grid,
        in_specs=in_specs,
        out_specs=pl.BlockSpec((TB, d_out), lambda i: (i, 0)),
        compiler_params=pltpu.CompilerParams(
            dimension_semantics=("parallel",),
            vmem_limit_bytes=32 * 1024 * 1024,
        ),
    )(*operands)

    # Only batch padding (if any) needs slicing; feature dims are exact.
    return out[:B] if B_pad != B else out


# ----------------------------------------------------------------------------
# Reference implementation (plain JAX, f32) for sanity check
# ----------------------------------------------------------------------------
def dnn_forward_ref(params, x):
    h = x
    for w, b in params[:-1]:
        h = jnp.maximum(h @ w + b, 0.0)
    return h @ params[-1][0]


if __name__ == "__main__":
    layers_size = (32, 64, 48, 16)   # MLP: 32 -> 64 -> 48 -> 16
    dropout = 0.1                    # identity at inference
    # TODO(synk): training-mode dropout (RNG mask + 1/(1-p) rescale) not
    # implemented; inference-mode dropout is the identity, matching forward().
    batch = 8

    key = jax.random.PRNGKey(0)
    key, kx = jax.random.split(key)
    x = jax.random.normal(kx, (batch, layers_size[0]), dtype=jnp.float32)

    params = init_dnn_params(key, layers_size)
    padded_params = pad_params_for_kernel(params, layers_size)

    out = dnn_forward(padded_params, x, layers_size)
    out = jax.block_until_ready(out)

    ref = dnn_forward_ref(params, x)
    assert out.shape == (batch, layers_size[-1])
    # bf16 matmul path (f32 accumulation) -> looser tolerance vs f32 reference.
    assert jnp.allclose(out, ref, atol=3e-2, rtol=3e-2), "mismatch vs reference"

    print("KERNEL_OK")
</pallas_src>

<mosaic_0001>
module attributes {stable_mosaic.version = 11 : i64} {
  func.func @kernel(%arg0: i32, %arg1: memref<8x32xf32, #tpu.memory_space<vmem>>, %arg2: memref<32x128xbf16, #tpu.memory_space<vmem>>, %arg3: memref<1x128xf32, #tpu.memory_space<vmem>>, %arg4: memref<128x128xbf16, #tpu.memory_space<vmem>>, %arg5: memref<1x128xf32, #tpu.memory_space<vmem>>, %arg6: memref<128x16xbf16, #tpu.memory_space<vmem>>, %arg7: memref<8x16xf32, #tpu.memory_space<vmem>>) attributes {dimension_semantics = [#tpu.dimension_semantics<parallel>], iteration_bounds = array<i64: 1>, scalar_prefetch = 0 : i64, scratch_operands = 0 : i64, tpu.core_type = #tpu.core_type<tc>, window_params = [{transform_indices = @transform_0, window_bounds = array<i64: 8, 32>}, {pipeline_mode = #tpu.pipeline_mode<synchronous>, transform_indices = @transform_1, window_bounds = array<i64: 32, 128>}, {pipeline_mode = #tpu.pipeline_mode<synchronous>, transform_indices = @transform_2, window_bounds = array<i64: 1, 128>}, {pipeline_mode = #tpu.pipeline_mode<synchronous>, transform_indices = @transform_3, window_bounds = array<i64: 128, 128>}, {pipeline_mode = #tpu.pipeline_mode<synchronous>, transform_indices = @transform_4, window_bounds = array<i64: 1, 128>}, {pipeline_mode = #tpu.pipeline_mode<synchronous>, transform_indices = @transform_5, window_bounds = array<i64: 128, 16>}, {transform_indices = @transform_6, window_bounds = array<i64: 8, 16>}]} {
    %c0 = arith.constant 0 : index
    %c0_0 = arith.constant 0 : index
    %0 = vector.load %arg1[%c0, %c0_0] : memref<8x32xf32, #tpu.memory_space<vmem>>, vector<8x32xf32>
    %1 = arith.truncf %0 : vector<8x32xf32> to vector<8x32xbf16>
    %c0_1 = arith.constant 0 : index
    %c0_2 = arith.constant 0 : index
    %2 = vector.load %arg2[%c0_1, %c0_2] : memref<32x128xbf16, #tpu.memory_space<vmem>>, vector<32x128xbf16>
    %c0_3 = arith.constant 0 : index
    %c0_4 = arith.constant 0 : index
    %3 = vector.load %arg3[%c0_3, %c0_4] : memref<1x128xf32, #tpu.memory_space<vmem>>, vector<1x128xf32>
    %cst = arith.constant dense<0.000000e+00> : vector<8x128xf32>
    %4 = tpu.matmul %1, %2, %cst {dimension_numbers = #tpu.dot_dimension_numbers<[1], [0], [0], [1], [0, 0, 1, 1], [], []>} : vector<8x32xbf16>, vector<32x128xbf16>, vector<8x128xf32> -> vector<8x128xf32>
    %5 = vector.broadcast %3 : vector<1x128xf32> to vector<8x128xf32>
    %6 = arith.addf %4, %5 : vector<8x128xf32>
    %cst_5 = arith.constant 0.000000e+00 : f32
    %7 = vector.broadcast %cst_5 : f32 to vector<8x128xf32>
    %8 = arith.maximumf %6, %7 : vector<8x128xf32>
    %9 = arith.truncf %8 : vector<8x128xf32> to vector<8x128xbf16>
    %c0_6 = arith.constant 0 : index
    %c0_7 = arith.constant 0 : index
    %10 = vector.load %arg4[%c0_6, %c0_7] : memref<128x128xbf16, #tpu.memory_space<vmem>>, vector<128x128xbf16>
    %c0_8 = arith.constant 0 : index
    %c0_9 = arith.constant 0 : index
    %11 = vector.load %arg5[%c0_8, %c0_9] : memref<1x128xf32, #tpu.memory_space<vmem>>, vector<1x128xf32>
    %cst_10 = arith.constant dense<0.000000e+00> : vector<8x128xf32>
    %12 = tpu.matmul %9, %10, %cst_10 {dimension_numbers = #tpu.dot_dimension_numbers<[1], [0], [0], [1], [0, 0, 1, 1], [], []>} : vector<8x128xbf16>, vector<128x128xbf16>, vector<8x128xf32> -> vector<8x128xf32>
    %13 = vector.broadcast %11 : vector<1x128xf32> to vector<8x128xf32>
    %14 = arith.addf %12, %13 : vector<8x128xf32>
    %cst_11 = arith.constant 0.000000e+00 : f32
    %15 = vector.broadcast %cst_11 : f32 to vector<8x128xf32>
    %16 = arith.maximumf %14, %15 : vector<8x128xf32>
    %17 = arith.truncf %16 : vector<8x128xf32> to vector<8x128xbf16>
    %c0_12 = arith.constant 0 : index
    %c0_13 = arith.constant 0 : index
    %18 = vector.load %arg6[%c0_12, %c0_13] : memref<128x16xbf16, #tpu.memory_space<vmem>>, vector<128x16xbf16>
    %cst_14 = arith.constant dense<0.000000e+00> : vector<8x16xf32>
    %19 = tpu.matmul %17, %18, %cst_14 {dimension_numbers = #tpu.dot_dimension_numbers<[1], [0], [0], [1], [0, 0, 1, 1], [], []>} : vector<8x128xbf16>, vector<128x16xbf16>, vector<8x16xf32> -> vector<8x16xf32>
    %c0_15 = arith.constant 0 : index
    %c0_16 = arith.constant 0 : index
    %20 = vector.load %arg7[%c0_15, %c0_16] : memref<8x16xf32, #tpu.memory_space<vmem>>, vector<8x16xf32>
    tpu.vector_store %arg7[%c0_15, %c0_16], %19 {strides = array<i32>} : memref<8x16xf32, #tpu.memory_space<vmem>>, vector<8x16xf32>,
    return
  }
  func.func @transform_0(%arg0: i32) -> (i32, i32) {
    %c0_i32 = arith.constant 0 : i32
    %c0_i32_0 = arith.constant 0 : i32
    return %arg0, %c0_i32 : i32, i32
  }
  func.func @transform_1(%arg0: i32) -> (i32, i32) {
    %c0_i32 = arith.constant 0 : i32
    %c0_i32_0 = arith.constant 0 : i32
    %c0_i32_1 = arith.constant 0 : i32
    return %c0_i32, %c0_i32_0 : i32, i32
  }
  func.func @transform_2(%arg0: i32) -> (i32, i32) {
    %c0_i32 = arith.constant 0 : i32
    %c0_i32_0 = arith.constant 0 : i32
    %c0_i32_1 = arith.constant 0 : i32
    return %c0_i32, %c0_i32_0 : i32, i32
  }
  func.func @transform_3(%arg0: i32) -> (i32, i32) {
    %c0_i32 = arith.constant 0 : i32
    %c0_i32_0 = arith.constant 0 : i32
    %c0_i32_1 = arith.constant 0 : i32
    return %c0_i32, %c0_i32_0 : i32, i32
  }
  func.func @transform_4(%arg0: i32) -> (i32, i32) {
    %c0_i32 = arith.constant 0 : i32
    %c0_i32_0 = arith.constant 0 : i32
    %c0_i32_1 = arith.constant 0 : i32
    return %c0_i32, %c0_i32_0 : i32, i32
  }
  func.func @transform_5(%arg0: i32) -> (i32, i32) {
    %c0_i32 = arith.constant 0 : i32
    %c0_i32_0 = arith.constant 0 : i32
    %c0_i32_1 = arith.constant 0 : i32
    return %c0_i32, %c0_i32_0 : i32, i32
  }
  func.func @transform_6(%arg0: i32) -> (i32, i32) {
    %c0_i32 = arith.constant 0 : i32
    %c0_i32_0 = arith.constant 0 : i32
    return %arg0, %c0_i32 : i32, i32
  }
}

</mosaic_0001>

<bundles_post_ra>
// kernel: dnn_forward.1
= control target key start
LH: loop header
LB: loop body
LE: loop exit
PB: predicated region body
PF: predicated region fallthrough
CT: control target
= control target key end

     0   :  { %11 = vsyncpa [#allocation3], 0  ;;  %s512_s0 = inlined_call_operand.vmem [shape: f32[8,32], index: 0, kind: input, shape index: {}]   ;;  %s513_s1 = inlined_call_operand.hbm [shape: bf16[32,128], index: 1, kind: input, shape index: {}]   ;;  %s514_s2 = inlined_call_operand.vmem [shape: f32[1,128], index: 2, kind: input, shape index: {}]   ;;  %s515_s3 = inlined_call_operand.vmem [shape: bf16[128,128], index: 3, kind: input, shape index: {}]   ;;  %s516_s4 = inlined_call_operand.vmem [shape: f32[1,128], index: 4, kind: input, shape index: {}]   ;;  %s517_s5 = inlined_call_operand.vmem [shape: bf16[128,16], index: 5, kind: input, shape index: {}]   ;;  %s518_s6 = inlined_call_operand.hbm [shape: f32[8,16], index: 6, kind: output, shape index: {}]  }
   0x1   :  { %12 = vsyncpa [#allocation4], 0  ;;  %s19_s23 = sshll.u32 %s513_s1, 4  ;;  %s410_s24 = smov [#allocation2]   ;;  %s20_s23 = int_to_ptr.hbm [resolvable:$true] %s19_s23 }
   0x2   :  { %s21_s25 = sshll.u32 %s410_s24, 4  ;;  %s411_s26 = smov 64   ;;  %s22_s25 = int_to_ptr.vmem [resolvable:$true] %s21_s25 }
   0x3   :  { %s412_s27 = smov 4  }
   0x4   :  { %27 = dma.hbm_to_vmem [thread:$0]  %s20_s23, 256, %s22_s25, [#allocation3], %s411_s26, %s411_s26, %s412_s27  }
   0x5   :  { %406 = dma.done.wait [#allocation3], 256  }
   0x6   :  { %407 = vsyncadd [#allocation3], 4294967040  ;;  %v335_v0 = vld [vmem:[#allocation2 + $0x8] sm:$0xff]  ;;  %v343_v1 = vld [vmem:[%s515_s3 + $0x38] sm:$0xff]  ;;  %vm63_vm0 = vcmask 261120   ;;  %s251_s16 = sshll.u32 %s518_s6, 4  ;;  %s252_s16 = int_to_ptr.hbm [resolvable:$true] %s251_s16 }
   0x7   :  { %73 = vmatpush.bf16.msra.mxu0 %v335_v0  ;;  %v334_v2 = vld [vmem:[#allocation2] sm:$0xff]  ;;  %150 = vmatpush.bf16.msra.mxu1 %v343_v1  ;;  %v342_v4 = vld [vmem:[%s515_s3 + $0x30] sm:$0xff]  ;;  %v341_v6 = vld [vmem:[%s515_s3 + $0x28] sm:$0xff]  ;;  %vm242_vm1 = vcmask 130048  }
   0x8   :  { %v41_v3 = vld [vmem:[%s512_s0] sm:$0xff]  ;;  %v339_v8 = vld [vmem:[%s515_s3 + $0x18] sm:$0xff]  ;;  %v338_v9 = vld [vmem:[%s515_s3 + $0x10] sm:$0xff] }
   0x9   :  { %v42_v5 = vpack.c.bf16 %v41_v3, %v41_v3  ;;  %v340_v7 = vld [vmem:[%s515_s3 + $0x20] sm:$0xff]  ;;  %v337_v10 = vld [vmem:[%s515_s3 + $0x8] sm:$0xff]  ;;  %v351_v12 = vld [vmem:[%s517_s5 + $0x38] sm:$0xff] }
   0xa   :  { %v336_v11 = vld [vmem:[%s515_s3] sm:$0xff]  ;;  %229 = vmatpush.bf16.msra.mxu2 %v351_v12  ;;  %v350_v13 = vld [vmem:[%s517_s5 + $0x30] sm:$0xff]  ;;  %v349_v14 = vld [vmem:[%s517_s5 + $0x28] sm:$0xff] }
   0xb   :  { %74 = vmatpush.bf16.msra.mxu0 %v334_v2  ;;  %151 = vmatpush.bf16.msra.mxu1 %v342_v4  ;;  %v348_v15 = vld [vmem:[%s517_s5 + $0x20] sm:$0xff]  ;;  %v347_v16 = vld [vmem:[%s517_s5 + $0x18] sm:$0xff]  ;;  %v346_v17 = vld [vmem:[%s517_s5 + $0x10] sm:$0xff] }
   0xc   :  { %v356_v18 = vld [vmem:[%s514_s2] ss:$0 sm:$0xff]  ;;  %v345_v24 = vld [vmem:[%s517_s5 + $0x8] sm:$0xff]  ;;  %s413_s2 = smov [#allocation5]  }
   0xd   :  { %v344_v25 = vld [vmem:[%s517_s5] sm:$0xff]  ;;  %s249_s13 = sshll.u32 %s413_s2, 4  ;;  %s250_s13 = int_to_ptr.vmem [resolvable:$true] %s249_s13 }
   0xe   :  { %269 = vmatmul.msk.bf16.vlgmr.msra.gmra.mxu0 %vm63_vm0, %v42_v5  ;;  %230 = vmatpush.bf16.msra.mxu2 %v350_v13  ;;  %v357_v26 = vld [vmem:[%s516_s4] ss:$0 sm:$0xff] }
   0xf   :  { %152 = vmatpush.bf16.msra.mxu1 %v341_v6 }
  0x12   :  { %231 = vmatpush.bf16.msra.mxu2 %v349_v14 }
  0x13   :  { %153 = vmatpush.bf16.msra.mxu1 %v340_v7 }
  0x16   :  { %232 = vmatpush.bf16.msra.mxu2 %v348_v15 }
  0x17   :  { %154 = vmatpush.bf16.msra.mxu1 %v339_v8 }
  0x1a   :  { %233 = vmatpush.bf16.msra.mxu2 %v347_v16 }
  0x1b   :  { %155 = vmatpush.bf16.msra.mxu1 %v338_v9 }
  0x1e   :  { %234 = vmatpush.bf16.msra.mxu2 %v346_v17 }
  0x1f   :  { %156 = vmatpush.bf16.msra.mxu1 %v337_v10 }
  0x22   :  { %235 = vmatpush.bf16.msra.mxu2 %v345_v24 }
  0x23   :  { %157 = vmatpush.bf16.msra.mxu1 %v336_v11 }
  0x26   :  { %236 = vmatpush.bf16.msra.mxu2 %v344_v25 }
  0x8b   :  { %v76_v19 = vpop.f32.mrf.mxu0 }
  0x8c   :  { %v77_v20 = vadd.f32 %v356_v18, %v76_v19 }
  0x8e   :  { %v80_v21 = vmax.f32 %v77_v20, 0.0 }
  0x90   :  { %v81_v22 = vpack.c.bf16 %v80_v21, %v80_v21 }
  0x92   :  { %158 = vmatmul.bf16.vlgmr.msra.gmra.mxu1 %v81_v22 }
  0x93   :  { %v78_v23 = vpop.f32.mrf.mxu0 }
 0x10f   :  { %v159_v27 = vpop.f32.mrf.mxu1 }
 0x110   :  { %v160_v28 = vadd.f32 %v357_v26, %v159_v27 }
 0x112   :  { %v163_v29 = vmax.f32 %v160_v28, 0.0 }
 0x114   :  { %v164_v30 = vpack.c.bf16 %v163_v29, %v163_v29 }
 0x116   :  { %237 = vmatmul.bf16.vlgmr.msra.gmra.mxu2 %v164_v30 }
 0x117   :  { %v161_v31 = vpop.f32.mrf.mxu1 }
 0x199   :  { %v238_v32 = vpop.f32.mrf.mxu2 }
 0x19a   :  { %243 = vst.msk [vmem:[#allocation5] sm:$0xff] %vm242_vm1, %v238_v32 }
 0x19b   :  { %254 = dma.vmem_to_hbm [thread:$0]  %s250_s13, 128, %s252_s16, [#allocation4]  }
 0x1a1   :  { %v240_v33 = vpop.f32.mrf.mxu2 }
 0x1a2   :  { %408 = dma.done.wait [#allocation4], 128  }
 0x1a3   :  { %409 = vsyncadd [#allocation4], 4294967168 }
 0x1a4   :  { %259 = vsyncpa [#allocation3], 1 }
 0x1a5   :  { %260 = vsyncpa [#allocation4], 1 }

</bundles_post_ra>
